<compile_context>
chip_gen: v5e
topology: v5e:2x2
jax: 0.10.0
libtpu: 0.0.40
codegen_flags: <defaults>
</compile_context>

<pallas_src>
import functools

import jax
import jax.numpy as jnp
from jax.experimental import pallas as pl
from jax.experimental.pallas import tpu as pltpu


def _sobel_kernel(x_ref, o_ref, *, img_h):
    """x_ref/o_ref: (TH, W) tile of images stacked along rows; TH % img_h == 0."""
    x = x_ref[...]                                   # (TH, W) float32
    th, w = x.shape

    # Row index of each element inside its own image (tiles start at image
    # boundaries, so local-row mod img_h is the image row).
    row = jax.lax.broadcasted_iota(jnp.int32, (th, w), 0) % img_h

    # Vertically shifted copies with the zero halo fused in:
    #   x_dn[r] = x[r-1] (0 above the top row of each image)
    #   x_up[r] = x[r+1] (0 below the bottom row of each image)
    zrow = jnp.zeros((1, w), jnp.float32)
    x_dn = jnp.concatenate([zrow, x[:-1, :]], axis=0)
    x_up = jnp.concatenate([x[1:, :], zrow], axis=0)
    x_dn = jnp.where(row == 0, 0.0, x_dn)
    x_up = jnp.where(row == img_h - 1, 0.0, x_up)

    # Separable Sobel: vertical smooth / difference first.
    s = x_dn + 2.0 * x + x_up                        # [1, 2, 1]^T applied vertically
    d = x_dn - x_up                                  # [1, 0, -1]^T applied vertically

    # Horizontal combination over a zero-padded (TH, W+2) strip (VMEM only).
    zcol = jnp.zeros((th, 1), jnp.float32)
    sp = jnp.concatenate([zcol, s, zcol], axis=1)
    dp = jnp.concatenate([zcol, d, zcol], axis=1)

    # Gx = [[2,0,-2],[4,0,-4],[2,0,-2]] ; Gy = [[2,4,2],[0,0,0],[-2,-4,-2]]
    gx = 2.0 * (sp[:, 0:w] - sp[:, 2:w + 2])
    gy = 2.0 * dp[:, 0:w] + 4.0 * d + 2.0 * dp[:, 2:w + 2]

    o_ref[...] = jnp.sqrt(gx * gx + gy * gy)


def _pick_row_block(n, h, w, target_bytes=2 << 20):
    """Rows per block: whole images only, divides N*H, ~<= target_bytes, legal tiling."""
    rows_total = n * h
    cap_imgs = max(1, min(n, target_bytes // max(1, 4 * h * w)))
    for k in range(cap_imgs, 0, -1):
        if n % k != 0:
            continue
        th = k * h
        # (8,128) rule: a non-full second-minor block dim must be divisible by 8.
        if th == rows_total or th % 8 == 0:
            return th
    # TODO(synk): halo-aware row tiling *inside* a single huge image when one
    # image alone exceeds the VMEM budget; fall back to the full slab for now.
    return rows_total


def sobel(img):
    """img: (N, 1, H, W) -> (N, 1, H, W) Sobel edge magnitude, float32."""
    n, c, h, w = img.shape
    assert c == 1, "Sobel module expects a single input channel"

    # Contiguous flatten; no padded HBM copy.
    x = img.astype(jnp.float32).reshape(n * h, w)

    rows = n * h
    th = _pick_row_block(n, h, w)
    grid = (rows // th,)

    out = pl.pallas_call(
        functools.partial(_sobel_kernel, img_h=h),
        out_shape=jax.ShapeDtypeStruct((rows, w), jnp.float32),
        grid_spec=pltpu.PrefetchScalarGridSpec(
            num_scalar_prefetch=0,
            grid=grid,
            in_specs=[pl.BlockSpec((th, w), lambda r: (r, 0))],
            out_specs=pl.BlockSpec((th, w), lambda r: (r, 0)),
        ),
        compiler_params=pltpu.CompilerParams(
            dimension_semantics=("parallel",),
            vmem_limit_bytes=32 * 1024 * 1024,
        ),
    )(x)

    return out.reshape(n, 1, h, w)


def _sobel_ref(img):
    """Pure-JAX reference matching the PyTorch module semantics."""
    gx = jnp.array([[2.0, 0.0, -2.0], [4.0, 0.0, -4.0], [2.0, 0.0, -2.0]])
    gy = jnp.array([[2.0, 4.0, 2.0], [0.0, 0.0, 0.0], [-2.0, -4.0, -2.0]])
    wgt = jnp.stack([gx, gy])[:, None]                       # (2, 1, 3, 3) OIHW
    y = jax.lax.conv_general_dilated(
        img.astype(jnp.float32), wgt, window_strides=(1, 1),
        padding=((1, 1), (1, 1)),
        dimension_numbers=("NCHW", "OIHW", "NCHW"))
    return jnp.sqrt(jnp.sum(y * y, axis=1, keepdims=True))


if __name__ == "__main__":
    key = jax.random.PRNGKey(0)
    img = jax.random.normal(key, (2, 1, 16, 16), dtype=jnp.float32)

    out = jax.block_until_ready(sobel(img))
    ref = jax.block_until_ready(_sobel_ref(img))

    assert out.shape == (2, 1, 16, 16), out.shape
    assert jnp.allclose(out, ref, atol=1e-4, rtol=1e-4), "mismatch vs reference"
    print("KERNEL_OK")
</pallas_src>

<mosaic_0001>
module attributes {stable_mosaic.version = 11 : i64} {
  func.func @_sobel_kernel(%arg0: i32, %arg1: memref<32x16xf32, #tpu.memory_space<vmem>>, %arg2: memref<32x16xf32, #tpu.memory_space<vmem>>) attributes {dimension_semantics = [#tpu.dimension_semantics<parallel>], iteration_bounds = array<i64: 1>, scalar_prefetch = 0 : i64, scratch_operands = 0 : i64, tpu.core_type = #tpu.core_type<tc>, window_params = [{transform_indices = @transform_0, window_bounds = array<i64: 32, 16>}, {transform_indices = @transform_1, window_bounds = array<i64: 32, 16>}]} {
    %c0 = arith.constant 0 : index
    %c0_0 = arith.constant 0 : index
    %0 = vector.load %arg1[%c0, %c0_0] : memref<32x16xf32, #tpu.memory_space<vmem>>, vector<32x16xf32>
    %1 = tpu.iota {dimensions = array<i32: 0>} : vector<32x16xi32>
    %c16_i32 = arith.constant 16 : i32
    %c0_i32 = arith.constant 0 : i32
    %2 = arith.cmpi eq, %c16_i32, %c0_i32 : i32
    %c1_i32 = arith.constant 1 : i32
    %3 = arith.select %2, %c1_i32, %c16_i32 : i32
    %4 = vector.broadcast %3 : i32 to vector<32x16xi32>
    %5 = arith.remsi %1, %4 : vector<32x16xi32>
    %c0_i32_1 = arith.constant 0 : i32
    %6 = vector.broadcast %c0_i32_1 : i32 to vector<32x16xi32>
    %7 = arith.cmpi ne, %5, %6 : vector<32x16xi32>
    %c0_i32_2 = arith.constant 0 : i32
    %8 = vector.broadcast %c0_i32_2 : i32 to vector<32x16xi32>
    %9 = arith.cmpi slt, %5, %8 : vector<32x16xi32>
    %c0_i32_3 = arith.constant 0 : i32
    %10 = arith.cmpi slt, %3, %c0_i32_3 : i32
    %11 = vector.broadcast %10 : i1 to vector<32x16xi1>
    %12 = vector.broadcast %11 : vector<32x16xi1> to vector<32x16xi1>
    %13 = arith.xori %9, %12 : vector<32x16xi1>
    %14 = arith.andi %13, %7 : vector<32x16xi1>
    %15 = vector.broadcast %3 : i32 to vector<32x16xi32>
    %16 = arith.addi %5, %15 : vector<32x16xi32>
    %17 = arith.select %14, %16, %5 : vector<32x16xi1>, vector<32x16xi32>
    %cst = arith.constant 0.000000e+00 : f32
    %18 = vector.broadcast %cst : f32 to vector<1x16xf32>
    %19 = vector.extract_strided_slice %0 {offsets = [0, 0], sizes = [31, 16], strides = [1, 1]} : vector<32x16xf32> to vector<31x16xf32>
    %20 = tpu.concatenate %18, %19 in 0 : vector<1x16xf32>, vector<31x16xf32> -> vector<32x16xf32>
    %21 = vector.extract_strided_slice %0 {offsets = [1, 0], sizes = [31, 16], strides = [1, 1]} : vector<32x16xf32> to vector<31x16xf32>
    %22 = tpu.concatenate %21, %18 in 0 : vector<31x16xf32>, vector<1x16xf32> -> vector<32x16xf32>
    %c0_i32_4 = arith.constant 0 : i32
    %23 = vector.broadcast %c0_i32_4 : i32 to vector<32x16xi32>
    %24 = arith.cmpi eq, %17, %23 : vector<32x16xi32>
    %cst_5 = arith.constant 0.000000e+00 : f32
    %25 = vector.broadcast %cst_5 : f32 to vector<32x16xf32>
    %26 = arith.select %24, %25, %20 : vector<32x16xi1>, vector<32x16xf32>
    %c15_i32 = arith.constant 15 : i32
    %27 = vector.broadcast %c15_i32 : i32 to vector<32x16xi32>
    %28 = arith.cmpi eq, %17, %27 : vector<32x16xi32>
    %cst_6 = arith.constant 0.000000e+00 : f32
    %29 = vector.broadcast %cst_6 : f32 to vector<32x16xf32>
    %30 = arith.select %28, %29, %22 : vector<32x16xi1>, vector<32x16xf32>
    %cst_7 = arith.constant 2.000000e+00 : f32
    %31 = vector.broadcast %cst_7 : f32 to vector<32x16xf32>
    %32 = arith.mulf %31, %0 : vector<32x16xf32>
    %33 = arith.addf %26, %32 : vector<32x16xf32>
    %34 = arith.addf %33, %30 : vector<32x16xf32>
    %35 = arith.subf %26, %30 : vector<32x16xf32>
    %cst_8 = arith.constant 0.000000e+00 : f32
    %36 = vector.broadcast %cst_8 : f32 to vector<32x1xf32>
    %37 = tpu.concatenate %36, %34, %36 in 1 : vector<32x1xf32>, vector<32x16xf32>, vector<32x1xf32> -> vector<32x18xf32>
    %38 = tpu.concatenate %36, %35, %36 in 1 : vector<32x1xf32>, vector<32x16xf32>, vector<32x1xf32> -> vector<32x18xf32>
    %39 = vector.extract_strided_slice %37 {offsets = [0, 0], sizes = [32, 16], strides = [1, 1]} : vector<32x18xf32> to vector<32x16xf32>
    %40 = vector.extract_strided_slice %37 {offsets = [0, 2], sizes = [32, 16], strides = [1, 1]} : vector<32x18xf32> to vector<32x16xf32>
    %41 = arith.subf %39, %40 : vector<32x16xf32>
    %cst_9 = arith.constant 2.000000e+00 : f32
    %42 = vector.broadcast %cst_9 : f32 to vector<32x16xf32>
    %43 = arith.mulf %42, %41 : vector<32x16xf32>
    %44 = vector.extract_strided_slice %38 {offsets = [0, 0], sizes = [32, 16], strides = [1, 1]} : vector<32x18xf32> to vector<32x16xf32>
    %cst_10 = arith.constant 2.000000e+00 : f32
    %45 = vector.broadcast %cst_10 : f32 to vector<32x16xf32>
    %46 = arith.mulf %45, %44 : vector<32x16xf32>
    %cst_11 = arith.constant 4.000000e+00 : f32
    %47 = vector.broadcast %cst_11 : f32 to vector<32x16xf32>
    %48 = arith.mulf %47, %35 : vector<32x16xf32>
    %49 = arith.addf %46, %48 : vector<32x16xf32>
    %50 = vector.extract_strided_slice %38 {offsets = [0, 2], sizes = [32, 16], strides = [1, 1]} : vector<32x18xf32> to vector<32x16xf32>
    %cst_12 = arith.constant 2.000000e+00 : f32
    %51 = vector.broadcast %cst_12 : f32 to vector<32x16xf32>
    %52 = arith.mulf %51, %50 : vector<32x16xf32>
    %53 = arith.addf %49, %52 : vector<32x16xf32>
    %54 = arith.mulf %43, %43 : vector<32x16xf32>
    %55 = arith.mulf %53, %53 : vector<32x16xf32>
    %56 = arith.addf %54, %55 : vector<32x16xf32>
    %57 = math.sqrt %56 : vector<32x16xf32>
    %c0_13 = arith.constant 0 : index
    %c0_14 = arith.constant 0 : index
    %58 = vector.load %arg2[%c0_13, %c0_14] : memref<32x16xf32, #tpu.memory_space<vmem>>, vector<32x16xf32>
    tpu.vector_store %arg2[%c0_13, %c0_14], %57 {strides = array<i32>} : memref<32x16xf32, #tpu.memory_space<vmem>>, vector<32x16xf32>,
    return
  }
  func.func @transform_0(%arg0: i32) -> (i32, i32) {
    %c0_i32 = arith.constant 0 : i32
    %c0_i32_0 = arith.constant 0 : i32
    return %arg0, %c0_i32 : i32, i32
  }
  func.func @transform_1(%arg0: i32) -> (i32, i32) {
    %c0_i32 = arith.constant 0 : i32
    %c0_i32_0 = arith.constant 0 : i32
    return %arg0, %c0_i32 : i32, i32
  }
}

</mosaic_0001>

<bundles_post_ra>
// kernel: tpu_custom_call.1
= control target key start
LH: loop header
LB: loop body
LE: loop exit
PB: predicated region body
PF: predicated region fallthrough
CT: control target
= control target key end

     0   :  { %v12_v0 = vlaneseq  ;;  %vm69_vm0 = vcmask 1040384   ;;  %vm82_vm1 = vcmask 1046528   ;;  %vm143_vm6 = vcmask 7168   ;;  %s313_s14 = smov 126   ;;  %s380_s0 = inlined_call_operand.vmem [shape: f32[32,16], index: 0, kind: input, shape index: {}]   ;;  %s381_s1 = inlined_call_operand.vmem [shape: f32[32,16], index: 1, kind: output, shape index: {}]  }
   0x1   :  { %v10_v1 = vld [vmem:[%s380_s0 + $0x10] sm:$0xff]  ;;  %v11_v2 = vld [vmem:[%s380_s0 + $0x18] sm:$0xff]  ;;  %v8_v3 = vld [vmem:[%s380_s0] sm:$0xff]  ;;  %vm148_vm7 = vcmask 138240   ;;  %vm293_vm8 = vcmask 130048  }
   0x2   :  { %v13_v4 = vshrl.u32 %v12_v0, 7  ;;  %v73_v5 = vrot.slane %v10_v1, 7  ;;  %v75_v6 = vrot.slane %v11_v2, 7  ;;  %v88_v7 = vrot.slane %v11_v2, 1  ;;  %v9_v8 = vld [vmem:[%s380_s0 + $0x8] sm:$0xff]  ;;  %s312_s0 = smov 1  }
   0x3   :  { %v114_v9 = vmul.f32 2.0, %v11_v2  ;;  %v70_v10 = vrot.slane %v8_v3, 7  ;;  %v71_v11 = vrot.slane %v9_v8, 7  ;;  %v83_v12 = vrot.slane %v8_v3, 1 }
   0x4   :  { %v16_v13 = vadd.s32 24, %v13_v4  ;;  %v76_v14 = vsel %vm69_vm0, %v73_v5, %v75_v6  ;;  %v94_v15 = vsel %vm82_vm1, %v88_v7, 0.0  ;;  %v21_v16 = vand.u32 15, %v13_v4 }
   0x5   :  { %v118_v17 = vadd.f32 %v114_v9, %v76_v14  ;;  %v81_v18 = vsel %vm69_vm0, 0.0, %v70_v10  ;;  %v84_v19 = vrot.slane %v9_v8, 1  ;;  %v111_v20 = vmul.f32 2.0, %v8_v3 }
   0x6   :  { %v42_v21 = vand.u32 15, %v16_v13  ;;  %vm95_vm2 = vcmp.eq.s32.totalorder %v21_v16, 0  ;;  %v15_v22 = vadd.s32 16, %v13_v4  ;;  %v74_v23 = vsel %vm69_vm0, %v71_v11, %v73_v5 }
   0x7   :  { %v85_v24 = vsel %vm82_vm1, %v83_v12, %v84_v19  ;;  %v99_v25 = vsel %vm95_vm2, 0.0, %v81_v18  ;;  %v86_v26 = vrot.slane %v10_v1, 1  ;;  %v113_v27 = vmul.f32 2.0, %v10_v1 }
   0x8   :  { %vm106_vm3 = vcmp.eq.s32.totalorder %v42_v21, 15  ;;  %v115_v28 = vadd.f32 %v111_v20, %v99_v25  ;;  %v35_v29 = vand.u32 15, %v15_v22  ;;  %v14_v30 = vadd.s32 8, %v13_v4 }
   0x9   :  { %v110_v31 = vsel %vm106_vm3, 0.0, %v94_v15  ;;  %v72_v32 = vsel %vm69_vm0, %v70_v10, %v71_v11  ;;  %v87_v35 = vsel %vm82_vm1, %v84_v19, %v86_v26  ;;  %v112_v38 = vmul.f32 2.0, %v9_v8 }
   0xa   :  { %v122_v33 = vadd.f32 %v118_v17, %v110_v31  ;;  %v119_v34 = vadd.f32 %v115_v28, %v85_v24  ;;  %vm97_vm4 = vcmp.eq.s32.totalorder %v35_v29, 0  ;;  %v28_v37 = vand.u32 15, %v14_v30 }
   0xb   :  { %v101_v36 = vsel %vm97_vm4, 0.0, %v74_v23  ;;  %v123_v39 = vsub.f32 %v99_v25, %v85_v24  ;;  %v89_v41 = vsel %vm82_vm1, %v86_v26, %v88_v7  ;;  %v116_v42 = vadd.f32 %v112_v38, %v72_v32 }
   0xc   :  { %137 = vrot.lane.b32.xlu1 %v122_v33, %s312_s0  ;;  %131 = vrot.lane.b32.xlu0 %v119_v34, %s312_s0  ;;  %v117_v40 = vadd.f32 %v113_v27, %v101_v36  ;;  %vm104_vm5 = vcmp.eq.s32.totalorder %v28_v37, 15  ;;  %v344_v47 = vsub.f32 %v76_v14, %v110_v31  ;;  %v125_v48 = vsub.f32 %v101_v36, %v89_v41 }
   0xd   :  { %157 = vrot.lane.b32.xlu2 %v123_v39, %s312_s0  ;;  %v108_v43 = vsel %vm104_vm5, 0.0, %v87_v35  ;;  %v205_v52 = vmul.f32 4.0, %v123_v39 }
   0xe   :  { %v121_v44 = vadd.f32 %v117_v40, %v89_v41  ;;  %v120_v45 = vadd.f32 %v116_v42, %v108_v43  ;;  %v124_v46 = vsub.f32 %v72_v32, %v108_v43  ;;  %v207_v17 = vmul.f32 4.0, %v125_v48 }
   0xf   :  { %v208_v39 = vmul.f32 4.0, %v344_v47 }
  0x10   :  { %v206_v27 = vmul.f32 4.0, %v124_v46 }
  0x14   :  { %135 = vrot.lane.b32.xlu1 %v121_v44, %s312_s0  ;;  %133 = vrot.lane.b32.xlu0 %v120_v45, %s312_s0 }
  0x15   :  { %159 = vrot.lane.b32.xlu2 %v124_v46, %s312_s0 }
  0x1c   :  { %161 = vrot.lane.b32.xlu0 %v125_v48, %s312_s0  ;;  %163 = vrot.lane.b32.xlu1 %v344_v47, %s312_s0 }
  0x67   :  { %v158_v49 = vpop.permute.xlu2 %157 }
  0x68   :  { %v169_v50 = vsel %vm143_vm6, 0.0, %v158_v49 }
  0x69   :  { %v173_v51 = vsel %vm148_vm7, %v169_v50, 0.0 }
  0x6a   :  { %v201_v53 = vmul.f32 2.0, %v173_v51 }
  0x6c   :  { %v209_v54 = vadd.f32 %v205_v52, %v201_v53 }
  0x6f   :  { %v160_v59 = vpop.permute.xlu2 %159 }
  0x70   :  { %v170_v1 = vsel %vm143_vm6, 0.0, %v160_v59 }
  0x71   :  { %v174_v5 = vsel %vm148_vm7, %v170_v1, 0.0 }
  0x72   :  { %v202_v6 = vmul.f32 2.0, %v174_v5 }
  0x74   :  { %v210_v34 = vadd.f32 %v206_v27, %v202_v6 }
  0x7e   :  { %v138_v55 = vpop.permute.xlu1 %137  ;;  %v132_v56 = vpop.permute.xlu0 %131 }
  0x7f   :  { %v144_v57 = vsel %vm143_vm6, 0.0, %v132_v56  ;;  %v147_v60 = vsel %vm143_vm6, 0.0, %v138_v55 }
  0x80   :  { %v149_v58 = vsel %vm148_vm7, %v144_v57, 0.0  ;;  %v152_v2 = vsel %vm148_vm7, %v147_v60, 0.0 }
  0x81   :  { %181 = vrot.lane.b32.xlu2 %v149_v58, %s313_s14 }
  0x86   :  { %v136_v61 = vpop.permute.xlu1 %135  ;;  %v134_v62 = vpop.permute.xlu0 %133 }
  0x87   :  { %v146_v63 = vsel %vm143_vm6, 0.0, %v136_v61  ;;  %v145_v0 = vsel %vm143_vm6, 0.0, %v134_v62 }
  0x88   :  { %v151_v3 = vsel %vm148_vm7, %v146_v63, 0.0  ;;  %v150_v4 = vsel %vm148_vm7, %v145_v0, 0.0 }
  0x89   :  { %185 = vrot.lane.b32.xlu1 %v151_v3, %s313_s14  ;;  %187 = vrot.lane.b32.xlu2 %v152_v2, %s313_s14 }
  0x8a   :  { %183 = vrot.lane.b32.xlu0 %v150_v4, %s313_s14 }
  0x8e   :  { %v162_v7 = vpop.permute.xlu0 %161  ;;  %v164_v8 = vpop.permute.xlu1 %163 }
  0x8f   :  { %v171_v9 = vsel %vm143_vm6, 0.0, %v162_v7  ;;  %v172_v11 = vsel %vm143_vm6, 0.0, %v164_v8 }
  0x90   :  { %v175_v10 = vsel %vm148_vm7, %v171_v9, 0.0  ;;  %v176_v13 = vsel %vm148_vm7, %v172_v11, 0.0 }
  0x91   :  { %v203_v12 = vmul.f32 2.0, %v175_v10  ;;  %219 = vrot.lane.b32.xlu1 %v202_v6, %s313_s14  ;;  %v204_v14 = vmul.f32 2.0, %v176_v13 }
  0x92   :  { %217 = vrot.lane.b32.xlu0 %v201_v53, %s313_s14 }
  0x93   :  { %221 = vrot.lane.b32.xlu2 %v203_v12, %s313_s14  ;;  %v211_v19 = vadd.f32 %v207_v17, %v203_v12  ;;  %v212_v50 = vadd.f32 %v208_v39, %v204_v14 }
  0x9a   :  { %223 = vrot.lane.b32.xlu0 %v204_v14, %s313_s14 }
  0xdb   :  { %v182_v15 = vpop.permute.xlu2 %181 }
  0xdc   :  { %v193_v24 = vsub.f32 %v149_v58, %v182_v15 }
  0xde   :  { %v197_v30 = vmul.f32 2.0, %v193_v24 }
  0xe0   :  { %v233_v38 = vmul.f32 %v197_v30, %v197_v30 }
  0xe3   :  { %v188_v16 = vpop.permute.xlu2 %187 }
  0xe4   :  { %v196_v40 = vsub.f32 %v152_v2, %v188_v16 }
  0xe6   :  { %v200_v48 = vmul.f32 2.0, %v196_v40 }
  0xe8   :  { %v236_v55 = vmul.f32 %v200_v48, %v200_v48 }
  0xed   :  { %v222_v18 = vpop.permute.xlu2 %221 }
  0xee   :  { %v231_v21 = vadd.f32 %v222_v18, %v211_v19 }
  0xf0   :  { %v239_v28 = vmul.f32 %v231_v21, %v231_v21 }
  0xfb   :  { %v186_v20 = vpop.permute.xlu1 %185 }
  0xfc   :  { %v195_v22 = vsub.f32 %v151_v3, %v186_v20  ;;  %v184_v23 = vpop.permute.xlu0 %183 }
  0xfd   :  { %v194_v26 = vsub.f32 %v150_v4, %v184_v23 }
  0xfe   :  { %v199_v25 = vmul.f32 2.0, %v195_v22 }
  0xff   :  { %v198_v32 = vmul.f32 2.0, %v194_v26 }
 0x100   :  { %v235_v29 = vmul.f32 %v199_v25, %v199_v25 }
 0x101   :  { %v234_v41 = vmul.f32 %v198_v32, %v198_v32 }
 0x102   :  { %v243_v31 = vadd.f32 %v239_v28, %v235_v29 }
 0x103   :  { %v220_v33 = vpop.permute.xlu1 %219 }
 0x104   :  { %304 = vrsqrt.f32 %v243_v31  ;;  %v218_v35 = vpop.permute.xlu0 %217  ;;  %v230_v36 = vadd.f32 %v220_v33, %v210_v34  ;;  %vm276_vm9 = vcmp.eq.f32.partialorder %v243_v31, inf  ;;  %v279_v2 = vand.u32 2147483648, %v243_v31 }
 0x105   :  { %v229_v37 = vadd.f32 %v218_v35, %v209_v54  ;;  %vm278_vm10 = vcmp.eq.f32.partialorder %v243_v31, 0.0 }
 0x106   :  { %v238_v42 = vmul.f32 %v230_v36, %v230_v36 }
 0x107   :  { %v237_v43 = vmul.f32 %v229_v37, %v229_v37 }
 0x108   :  { %v242_v44 = vadd.f32 %v238_v42, %v234_v41 }
 0x109   :  { %v241_v45 = vadd.f32 %v237_v43, %v233_v38 }
 0x10a   :  { %v305_v46 = vpop.eup %304  ;;  %306 = vrsqrt.f32 %v242_v44  ;;  %vm264_vm11 = vcmp.eq.f32.partialorder %v242_v44, inf  ;;  %vm266_vm12 = vcmp.eq.f32.partialorder %v242_v44, 0.0  ;;  %v267_v15 = vand.u32 2147483648, %v242_v44 }
 0x10b   :  { %v270_v49 = vmul.f32 %v305_v46, %v243_v31  ;;  %308 = vrsqrt.f32 %v241_v45  ;;  %vm252_vm13 = vcmp.eq.f32.partialorder %v241_v45, inf  ;;  %v255_v18 = vand.u32 2147483648, %v241_v45 }
 0x10c   :  { %v224_v51 = vpop.permute.xlu0 %223  ;;  %vm254_vm14 = vcmp.eq.f32.partialorder %v241_v45, 0.0 }
 0x10d   :  { %v271_v52 = vmul.f32 %v305_v46, %v270_v49  ;;  %v232_v53 = vadd.f32 %v224_v51, %v212_v50 }
 0x10f   :  { %v272_v54 = vmul.f32 0.5, %v271_v52  ;;  %v240_v56 = vmul.f32 %v232_v53, %v232_v53 }
 0x110   :  { %v307_v57 = vpop.eup %306 }
 0x111   :  { %v273_v47 = vsub.f32 1.5, %v272_v54  ;;  %v244_v58 = vadd.f32 %v240_v56, %v236_v55  ;;  %v309_v59 = vpop.eup %308  ;;  %v258_v60 = vmul.f32 %v307_v57, %v242_v44 }
 0x112   :  { %v246_v62 = vmul.f32 %v309_v59, %v241_v45 }
 0x113   :  { %v274_v61 = vmul.f32 %v305_v46, %v273_v47  ;;  %310 = vrsqrt.f32 %v244_v58  ;;  %v259_v63 = vmul.f32 %v307_v57, %v258_v60  ;;  %vm288_vm15 = vcmp.eq.f32.partialorder %v244_v58, inf }
 0x114   :  { %v247_v1 = vmul.f32 %v309_v59, %v246_v62  ;;  %v291_v26 = vand.u32 2147483648, %v244_v58  ;;  %vm290_vm0 = vcmp.eq.f32.partialorder %v244_v58, 0.0 }
 0x115   :  { %v275_v0 = vmul.f32 %v274_v61, %v243_v31  ;;  %v260_v3 = vmul.f32 0.5, %v259_v63 }
 0x116   :  { %v248_v5 = vmul.f32 0.5, %v247_v1 }
 0x117   :  { %v277_v4 = vsel %vm276_vm9, %v243_v31, %v275_v0  ;;  %v261_v7 = vsub.f32 1.5, %v260_v3 }
 0x118   :  { %v280_v6 = vsel %vm278_vm10, %v279_v2, %v277_v4  ;;  %v249_v9 = vsub.f32 1.5, %v248_v5 }
 0x119   :  { %v311_v8 = vpop.eup %310  ;;  %296 = vst.msk [vmem:[%s381_s1 + $0x10] sm:$0xff] %vm293_vm8, %v280_v6  ;;  %v262_v10 = vmul.f32 %v307_v57, %v261_v7 }
 0x11a   :  { %v282_v11 = vmul.f32 %v311_v8, %v244_v58  ;;  %v250_v12 = vmul.f32 %v309_v59, %v249_v9 }
 0x11b   :  { %v263_v13 = vmul.f32 %v262_v10, %v242_v44 }
 0x11c   :  { %v283_v14 = vmul.f32 %v311_v8, %v282_v11  ;;  %v251_v16 = vmul.f32 %v250_v12, %v241_v45 }
 0x11d   :  { %v265_v17 = vsel %vm264_vm11, %v242_v44, %v263_v13 }
 0x11e   :  { %v284_v19 = vmul.f32 0.5, %v283_v14  ;;  %v268_v20 = vsel %vm266_vm12, %v267_v15, %v265_v17  ;;  %v253_v21 = vsel %vm252_vm13, %v241_v45, %v251_v16 }
 0x11f   :  { %295 = vst.msk [vmem:[%s381_s1 + $0x8] sm:$0xff] %vm293_vm8, %v268_v20  ;;  %v256_v22 = vsel %vm254_vm14, %v255_v18, %v253_v21 }
 0x120   :  { %v285_v23 = vsub.f32 1.5, %v284_v19  ;;  %294 = vst.msk [vmem:[%s381_s1] sm:$0xff] %vm293_vm8, %v256_v22 }
 0x122   :  { %v286_v24 = vmul.f32 %v311_v8, %v285_v23 }
 0x124   :  { %v287_v25 = vmul.f32 %v286_v24, %v244_v58 }
 0x126   :  { %v289_v27 = vsel %vm288_vm15, %v244_v58, %v287_v25 }
 0x127   :  { %v292_v28 = vsel %vm290_vm0, %v291_v26, %v289_v27 }
 0x128   :  { %297 = vst.msk [vmem:[%s381_s1 + $0x18] sm:$0xff] %vm293_vm8, %v292_v28 }

</bundles_post_ra>
